<compile_context>
chip_gen: v6e
topology: v6e:2x2x1
jax: 0.10.0
libtpu: 0.0.40
codegen_flags: <defaults>
</compile_context>

<pallas_src>
import jax
import jax.numpy as jnp
from jax.experimental import pallas as pl
from jax.experimental.pallas import tpu as pltpu

_SUB = 8
_LANE = 128
_GROUP = _SUB * _LANE  # 1024 batch elements per dense (8, 128) vreg group

# Membership constants from the PyTorch module, in OUTPUT row order
# [false, partial, true] (matches probs class order [0, 1, 2]).
_MF_LO = (0.0, 0.25, 0.7)      # mf[0] per output row
_MF_DEN = (0.15, 0.25, 0.15)   # mf[1] - mf[0] per output row


def _fold_constants(weights):
    """k/b such that out[:, j] = probs[:, j] * k[j] + b[j]."""
    weights = weights.astype(jnp.float32)
    lo = jnp.array(_MF_LO, jnp.float32)
    den = jnp.array(_MF_DEN, jnp.float32)
    # weights[0] -> true row, weights[1] -> partial row, weights[2] -> false row
    w_perm = jnp.stack([weights[2], weights[1], weights[0]])
    k = w_perm / den
    b = -lo * k
    return k, b


def _fused_jax(logits, weights):
    """Small-batch fast path: identical math, no kernel launch / repack cost."""
    k, b = _fold_constants(weights)
    probs = jax.nn.softmax(logits.astype(jnp.float32), axis=1)
    return probs * k[None, :] + b[None, :]


def fuzzy_kernel(k_ref, b_ref, x_ref, out_ref):
    """k_ref/b_ref: (3,) f32 in SMEM; x_ref/out_ref: (3, bt, 8, 128) f32.

    The batch is packed densely on (sublane, lane); the 3-class softmax is
    pure elementwise VPU work across the three (bt, 8, 128) slabs.
    """
    x0 = x_ref[0]  # class 0 -> "false" output row
    x1 = x_ref[1]  # class 1 -> "partial" output row
    x2 = x_ref[2]  # class 2 -> "true" output row

    # Numerically-stable softmax over the 3 classes (elementwise, no XLU).
    m = jnp.maximum(jnp.maximum(x0, x1), x2)
    e0 = jnp.exp(x0 - m)
    e1 = jnp.exp(x1 - m)
    e2 = jnp.exp(x2 - m)
    inv = 1.0 / (e0 + e1 + e2)  # exact divide: kernel is mem-bound, it's free

    # probs_j = e_j * inv ; out_j = probs_j * k_j + b_j (affine pre-folded).
    out_ref[0] = e0 * (inv * k_ref[0]) + b_ref[0]
    out_ref[1] = e1 * (inv * k_ref[1]) + b_ref[1]
    out_ref[2] = e2 * (inv * k_ref[2]) + b_ref[2]


def fuzzy_logic_layer(logits, weights, *, block_b=131072,
                      min_kernel_batch=32768, force_kernel=False):
    """logits: (B, 3); weights: (3,) in the PyTorch parameter order."""
    B, C = logits.shape
    assert C == 3

    if B < min_kernel_batch and not force_kernel:
        return _fused_jax(logits, weights)

    logits = logits.astype(jnp.float32)
    k, b = _fold_constants(weights)

    # Pack the batch densely into groups of 8*128 = 1024 elements.
    n_groups = pl.cdiv(B, _GROUP)
    bt = max(1, min(pl.cdiv(block_b, _GROUP), n_groups))
    if n_groups >= 2:
        # Keep at least 2 grid steps so v7x can shard across both TensorCores.
        bt = min(bt, pl.cdiv(n_groups, 2))
    n_tiles = pl.cdiv(n_groups, bt)
    g_pad = n_tiles * bt
    b_pad = g_pad * _GROUP

    # One wrapper pass in: transpose + pad (fused by XLA); the reshape to
    # (3, g_pad, 8, 128) is a free row-major view of the packed batch.
    x_packed = jnp.pad(logits.T, ((0, 0), (0, b_pad - B))).reshape(
        3, g_pad, _SUB, _LANE)

    out_packed = pl.pallas_call(
        fuzzy_kernel,
        out_shape=jax.ShapeDtypeStruct((3, g_pad, _SUB, _LANE), jnp.float32),
        grid=(n_tiles,),
        in_specs=[
            pl.BlockSpec(memory_space=pltpu.MemorySpace.SMEM),  # k (3,)
            pl.BlockSpec(memory_space=pltpu.MemorySpace.SMEM),  # b (3,)
            pl.BlockSpec((3, bt, _SUB, _LANE), lambda i: (0, i, 0, 0)),
        ],
        out_specs=pl.BlockSpec((3, bt, _SUB, _LANE), lambda i: (0, i, 0, 0)),
        compiler_params=pltpu.CompilerParams(
            dimension_semantics=("parallel",),
        ),
    )(k, b, x_packed)

    # TODO(synk): if the consumer can accept the packed (3, B) layout, skip
    # this final reshape/slice/transpose HBM pass.
    return out_packed.reshape(3, b_pad)[:, :B].T


def fuzzy_logic_layer_ref(logits, weights):
    """Pure-JAX reference mirroring the PyTorch forward exactly."""
    probs = jax.nn.softmax(logits.astype(jnp.float32), axis=1)
    true_mf = jnp.array([0.7, 0.85, 1.0], jnp.float32)
    false_mf = jnp.array([0.0, 0.15, 0.3], jnp.float32)
    partial_mf = jnp.array([0.25, 0.5, 0.75], jnp.float32)
    true_score = (probs[:, 2] - true_mf[0]) / (true_mf[1] - true_mf[0]) * weights[0]
    false_score = (probs[:, 0] - false_mf[0]) / (false_mf[1] - false_mf[0]) * weights[2]
    partial_score = (probs[:, 1] - partial_mf[0]) / (partial_mf[1] - partial_mf[0]) * weights[1]
    return jnp.stack([false_score, partial_score, true_score], axis=1)


if __name__ == "__main__":
    key = jax.random.PRNGKey(0)
    k1, k2 = jax.random.split(key)

    # nn.Parameter(torch.tensor([10.0, 10.0, 10.0])) — deterministic init.
    weights = jnp.array([10.0, 10.0, 10.0], dtype=jnp.float32)

    # Small case (B=8), forced onto the kernel path: one (3, 1, 8, 128) tile.
    logits = jax.random.normal(k1, (8, 3), dtype=jnp.float32)
    ref = fuzzy_logic_layer_ref(logits, weights)
    out = jax.block_until_ready(fuzzy_logic_layer(logits, weights, force_kernel=True))
    assert out.shape == (8, 3)
    assert jnp.allclose(out, ref, atol=1e-3, rtol=1e-5), (out, ref)

    # Small-batch fast path (default dispatch) must match too.
    out_fast = jax.block_until_ready(fuzzy_logic_layer(logits, weights))
    assert jnp.allclose(out_fast, ref, atol=1e-3, rtol=1e-5), (out_fast, ref)

    # Ragged case exercising group padding + a multi-step grid:
    # B=2500 -> 3 groups of 1024, block_b=1024 -> bt=1, grid=(3,).
    logits2 = jax.random.normal(k2, (2500, 3), dtype=jnp.float32)
    ref2 = fuzzy_logic_layer_ref(logits2, weights)
    out2 = jax.block_until_ready(
        fuzzy_logic_layer(logits2, weights, block_b=1024, force_kernel=True))
    assert out2.shape == (2500, 3)
    assert jnp.allclose(out2, ref2, atol=1e-3, rtol=1e-5), (out2, ref2)

    print("KERNEL_OK")
</pallas_src>

<mosaic_0001>
module attributes {stable_mosaic.version = 11 : i64} {
  func.func @fuzzy_kernel(%arg0: i32, %arg1: memref<3xf32, #tpu.memory_space<smem>>, %arg2: memref<3xf32, #tpu.memory_space<smem>>, %arg3: memref<3x1x8x128xf32, #tpu.memory_space<vmem>>, %arg4: memref<3x1x8x128xf32, #tpu.memory_space<vmem>>) attributes {dimension_semantics = [#tpu.dimension_semantics<parallel>], iteration_bounds = array<i64: 1>, scalar_prefetch = 0 : i64, scratch_operands = 0 : i64, tpu.core_type = #tpu.core_type<tc>, window_params = [{transform_indices = @transform_0, window_bounds = array<i64: 3>}, {transform_indices = @transform_1, window_bounds = array<i64: 3>}, {transform_indices = @transform_2, window_bounds = array<i64: 3, 1, 8, 128>}, {transform_indices = @transform_3, window_bounds = array<i64: 3, 1, 8, 128>}]} {
    %c0 = arith.constant 0 : index
    %c0_0 = arith.constant 0 : index
    %c0_1 = arith.constant 0 : index
    %c0_2 = arith.constant 0 : index
    %0 = vector.load %arg3[%c0, %c0_0, %c0_1, %c0_2] : memref<3x1x8x128xf32, #tpu.memory_space<vmem>>, vector<1x1x8x128xf32>
    %1 = vector.shape_cast %0 : vector<1x1x8x128xf32> to vector<1x8x128xf32>
    %c1 = arith.constant 1 : index
    %c0_3 = arith.constant 0 : index
    %c0_4 = arith.constant 0 : index
    %c0_5 = arith.constant 0 : index
    %2 = vector.load %arg3[%c1, %c0_3, %c0_4, %c0_5] : memref<3x1x8x128xf32, #tpu.memory_space<vmem>>, vector<1x1x8x128xf32>
    %3 = vector.shape_cast %2 : vector<1x1x8x128xf32> to vector<1x8x128xf32>
    %c2 = arith.constant 2 : index
    %c0_6 = arith.constant 0 : index
    %c0_7 = arith.constant 0 : index
    %c0_8 = arith.constant 0 : index
    %4 = vector.load %arg3[%c2, %c0_6, %c0_7, %c0_8] : memref<3x1x8x128xf32, #tpu.memory_space<vmem>>, vector<1x1x8x128xf32>
    %5 = vector.shape_cast %4 : vector<1x1x8x128xf32> to vector<1x8x128xf32>
    %6 = arith.maximumf %1, %3 : vector<1x8x128xf32>
    %7 = arith.maximumf %6, %5 : vector<1x8x128xf32>
    %8 = arith.subf %1, %7 : vector<1x8x128xf32>
    %9 = math.exp %8 : vector<1x8x128xf32>
    %10 = arith.subf %3, %7 : vector<1x8x128xf32>
    %11 = math.exp %10 : vector<1x8x128xf32>
    %12 = arith.subf %5, %7 : vector<1x8x128xf32>
    %13 = math.exp %12 : vector<1x8x128xf32>
    %14 = arith.addf %9, %11 : vector<1x8x128xf32>
    %15 = arith.addf %14, %13 : vector<1x8x128xf32>
    %cst = arith.constant 1.000000e+00 : f32
    %16 = vector.broadcast %cst : f32 to vector<1x8x128xf32>
    %17 = arith.divf %16, %15 : vector<1x8x128xf32>
    %c0_9 = arith.constant 0 : index
    %18 = memref.load %arg1[%c0_9] : memref<3xf32, #tpu.memory_space<smem>>
    %19 = vector.broadcast %18 : f32 to vector<1x8x128xf32>
    %20 = arith.mulf %17, %19 : vector<1x8x128xf32>
    %21 = arith.mulf %9, %20 : vector<1x8x128xf32>
    %c0_10 = arith.constant 0 : index
    %22 = memref.load %arg2[%c0_10] : memref<3xf32, #tpu.memory_space<smem>>
    %23 = vector.broadcast %22 : f32 to vector<1x8x128xf32>
    %24 = arith.addf %21, %23 : vector<1x8x128xf32>
    %c0_11 = arith.constant 0 : index
    %c0_12 = arith.constant 0 : index
    %c0_13 = arith.constant 0 : index
    %c0_14 = arith.constant 0 : index
    %25 = vector.load %arg4[%c0_11, %c0_12, %c0_13, %c0_14] : memref<3x1x8x128xf32, #tpu.memory_space<vmem>>, vector<1x1x8x128xf32>
    %26 = vector.shape_cast %25 : vector<1x1x8x128xf32> to vector<1x8x128xf32>
    %27 = vector.shape_cast %24 : vector<1x8x128xf32> to vector<1x1x8x128xf32>
    tpu.vector_store %arg4[%c0_11, %c0_12, %c0_13, %c0_14], %27 {strides = array<i32>} : memref<3x1x8x128xf32, #tpu.memory_space<vmem>>, vector<1x1x8x128xf32>,
    %c1_15 = arith.constant 1 : index
    %28 = memref.load %arg1[%c1_15] : memref<3xf32, #tpu.memory_space<smem>>
    %29 = vector.broadcast %28 : f32 to vector<1x8x128xf32>
    %30 = arith.mulf %17, %29 : vector<1x8x128xf32>
    %31 = arith.mulf %11, %30 : vector<1x8x128xf32>
    %c1_16 = arith.constant 1 : index
    %32 = memref.load %arg2[%c1_16] : memref<3xf32, #tpu.memory_space<smem>>
    %33 = vector.broadcast %32 : f32 to vector<1x8x128xf32>
    %34 = arith.addf %31, %33 : vector<1x8x128xf32>
    %c1_17 = arith.constant 1 : index
    %c0_18 = arith.constant 0 : index
    %c0_19 = arith.constant 0 : index
    %c0_20 = arith.constant 0 : index
    %35 = vector.load %arg4[%c1_17, %c0_18, %c0_19, %c0_20] : memref<3x1x8x128xf32, #tpu.memory_space<vmem>>, vector<1x1x8x128xf32>
    %36 = vector.shape_cast %35 : vector<1x1x8x128xf32> to vector<1x8x128xf32>
    %37 = vector.shape_cast %34 : vector<1x8x128xf32> to vector<1x1x8x128xf32>
    tpu.vector_store %arg4[%c1_17, %c0_18, %c0_19, %c0_20], %37 {strides = array<i32>} : memref<3x1x8x128xf32, #tpu.memory_space<vmem>>, vector<1x1x8x128xf32>,
    %c2_21 = arith.constant 2 : index
    %38 = memref.load %arg1[%c2_21] : memref<3xf32, #tpu.memory_space<smem>>
    %39 = vector.broadcast %38 : f32 to vector<1x8x128xf32>
    %40 = arith.mulf %17, %39 : vector<1x8x128xf32>
    %41 = arith.mulf %13, %40 : vector<1x8x128xf32>
    %c2_22 = arith.constant 2 : index
    %42 = memref.load %arg2[%c2_22] : memref<3xf32, #tpu.memory_space<smem>>
    %43 = vector.broadcast %42 : f32 to vector<1x8x128xf32>
    %44 = arith.addf %41, %43 : vector<1x8x128xf32>
    %c2_23 = arith.constant 2 : index
    %c0_24 = arith.constant 0 : index
    %c0_25 = arith.constant 0 : index
    %c0_26 = arith.constant 0 : index
    %45 = vector.load %arg4[%c2_23, %c0_24, %c0_25, %c0_26] : memref<3x1x8x128xf32, #tpu.memory_space<vmem>>, vector<1x1x8x128xf32>
    %46 = vector.shape_cast %45 : vector<1x1x8x128xf32> to vector<1x8x128xf32>
    %47 = vector.shape_cast %44 : vector<1x8x128xf32> to vector<1x1x8x128xf32>
    tpu.vector_store %arg4[%c2_23, %c0_24, %c0_25, %c0_26], %47 {strides = array<i32>} : memref<3x1x8x128xf32, #tpu.memory_space<vmem>>, vector<1x1x8x128xf32>,
    return
  }
  func.func @transform_0(%arg0: i32) -> i32 {
    %c0_i32 = arith.constant 0 : i32
    %c0_i32_0 = arith.constant 0 : i32
    return %c0_i32 : i32
  }
  func.func @transform_1(%arg0: i32) -> i32 {
    %c0_i32 = arith.constant 0 : i32
    %c0_i32_0 = arith.constant 0 : i32
    return %c0_i32 : i32
  }
  func.func @transform_2(%arg0: i32) -> (i32, i32, i32, i32) {
    %c0_i32 = arith.constant 0 : i32
    %c0_i32_0 = arith.constant 0 : i32
    %c0_i32_1 = arith.constant 0 : i32
    %c0_i32_2 = arith.constant 0 : i32
    return %c0_i32, %arg0, %c0_i32_0, %c0_i32_1 : i32, i32, i32, i32
  }
  func.func @transform_3(%arg0: i32) -> (i32, i32, i32, i32) {
    %c0_i32 = arith.constant 0 : i32
    %c0_i32_0 = arith.constant 0 : i32
    %c0_i32_1 = arith.constant 0 : i32
    %c0_i32_2 = arith.constant 0 : i32
    return %c0_i32, %arg0, %c0_i32_0, %c0_i32_1 : i32, i32, i32, i32
  }
}

</mosaic_0001>

<bundles_post_ra>
// kernel: tpu_custom_call.1
= control target key start
LH: loop header
LB: loop body
LE: loop exit
PB: predicated region body
PF: predicated region fallthrough
CT: control target
= control target key end

     0   :  { %8 = vsyncpa [#allocation5], 0  ;;  %s247_s0 = inlined_call_operand.hbm [shape: f32[3], index: 0, kind: input, shape index: {}]   ;;  %s248_s1 = inlined_call_operand.vmem [shape: f32[3], index: 1, kind: input, shape index: {}]   ;;  %s249_s2 = inlined_call_operand.hbm [shape: f32[3,1,8,128], index: 2, kind: input, shape index: {}]   ;;  %s250_s3 = inlined_call_operand.hbm [shape: f32[3,1,8,128], index: 3, kind: output, shape index: {}]  }
   0x1   :  { %9 = vsyncpa [#allocation6], 0 }
   0x2   :  { %10 = vsyncpa [#allocation3], 0 }
   0x3   :  { %11 = vsyncpa [#allocation4], 0  ;;  %s26_s14 = sshll.u32 %s248_s1, 4  ;;  %s203_s15 = smov [#allocation2]   ;;  %s27_s14 = int_to_ptr.vmem [resolvable:$true] %s26_s14 }
   0x4   :  { %19 = dma.hbm_to_smem %s247_s0, 16, %s203_s15, [#allocation5]  }
   0x5   :  { %s143_s18 = scalar_lea.vmem %s27_s14, 16  ;;  %p148_p1 = scmp.lt.s32.totalorder %s27_s14, %s27_s14 }
   0x6   :  { %p144_p0 = scmp.ne.s32.totalorder %s27_s14, %s143_s18  ;;  %p149_p2 = scmp.lt.s32.totalorder %s143_s18, %s143_s18 }
   0x8   :  { %p150_p3 = por %p149_p2, %p148_p1 }
   0xa   :  { %p151_p4 = pnand %p150_p3, %p144_p0 }
   0xc   :  { %154 = shalt.err (!%p151_p4)
}
   0xd   :  { %s204_s19 = smov [#allocation7]   ;;  %s205_s20 = smov [#allocation8]  }
   0xe   :  { %29 = dma.vmem_to_smem %s27_s14, 16, %s204_s19, [#allocation6]  }
   0xf   :  { %s35_s21 = sshll.u32 %s205_s20, 4  ;;  %s36_s21 = int_to_ptr.vmem [resolvable:$true] %s35_s21 }
  0x10   :  { %s163_s22 = scalar_lea.vmem %s36_s21, 384  ;;  %p168_p6 = scmp.lt.s32.totalorder %s36_s21, %s36_s21 }
  0x11   :  { %p164_p5 = scmp.ne.s32.totalorder %s36_s21, %s163_s22  ;;  %p169_p7 = scmp.lt.s32.totalorder %s163_s22, %s163_s22 }
  0x13   :  { %p170_p8 = por %p169_p7, %p168_p6 }
  0x15   :  { %p171_p9 = pnand %p170_p8, %p164_p5 }
  0x17   :  { %174 = shalt.err (!%p171_p9)
}
  0x18   :  { %s206_s0 = smov 128   ;;  %s207_s1 = smov 8  }
  0x19   :  { %41 = dma.hbm_to_vmem [thread:$0]  %s249_s2, 384, %s36_s21, [#allocation3], %s206_s0, %s206_s0, %s207_s1  }
  0x1a   :  { %195 = dma.done.wait [#allocation5], 16  }
  0x1b   :  { %196 = vsyncadd [#allocation5], 4294967280 }
  0x1c   :  { %197 = dma.done.wait [#allocation6], 16  }
  0x1d   :  { %198 = vsyncadd [#allocation6], 4294967280 }
  0x1e   :  { %199 = dma.done.wait [#allocation3], 384  }
  0x1f   :  { %200 = vsyncadd [#allocation3], 4294966912 }
  0x20   :  { %51 = sfence }
  0x21   :  { %v52_v0 = vld [vmem:[#allocation8] sm:$0xff]  ;;  %v54_v1 = vld [vmem:[#allocation8 + $0x8] sm:$0xff]  ;;  %v56_v2 = vld [vmem:[#allocation8 + $0x10] sm:$0xff]  ;;  %s72_s2 = sld [smem:[#allocation2]]  ;;  %s208_s30 = smov [#allocation9]  }
  0x22   :  { %v57_v3 = vmax.f32 %v52_v0, %v54_v1  ;;  %s117_s25 = sld [smem:[#allocation2 + $0x1]]  ;;  %s103_s4 = sshll.u32 %s208_s30, 4  ;;  %s104_s4 = int_to_ptr.vmem [resolvable:$true] %s103_s4 }
  0x23   :  { %s119_s26 = sld [smem:[#allocation2 + $0x2]]  ;;  %s175_s5 = scalar_lea.vmem %s104_s4, 384 }
  0x24   :  { %v58_v4 = vmax.f32 %v57_v3, %v56_v2  ;;  %s76_s27 = sld [smem:[#allocation7]]  ;;  %p176_p10 = scmp.ne.s32.totalorder %s104_s4, %s175_s5 }
  0x25   :  { %s118_s28 = sld [smem:[#allocation7 + $0x1]]  ;;  %p180_p11 = scmp.lt.s32.totalorder %s104_s4, %s104_s4 }
  0x26   :  { %v59_v5 = vsub.f32 %v52_v0, %v58_v4  ;;  %v62_v6 = vsub.f32 %v54_v1, %v58_v4  ;;  %v65_v7 = vsub.f32 %v56_v2, %v58_v4  ;;  %s120_s29 = sld [smem:[#allocation7 + $0x2]]  ;;  %p181_p12 = scmp.lt.s32.totalorder %s175_s5, %s175_s5 }
  0x27   :  { %v73_v16 = vstv %s72_s2 }
  0x28   :  { %v60_v8 = vmul.f32 1.442695, %v59_v5  ;;  %v63_v9 = vmul.f32 1.442695, %v62_v6  ;;  %v66_v10 = vmul.f32 1.442695, %v65_v7  ;;  %v81_v17 = vstv %s117_s25  ;;  %p182_p13 = por %p181_p12, %p180_p11 }
  0x29   :  { %v90_v18 = vstv %s119_s26 }
  0x2a   :  { %127 = vpow2.f32 %v60_v8  ;;  %v77_v23 = vstv %s76_s27  ;;  %p183_p0 = pnand %p182_p13, %p176_p10 }
  0x2b   :  { %129 = vpow2.f32 %v63_v9  ;;  %v85_v24 = vstv %s118_s28 }
  0x2c   :  { %131 = vpow2.f32 %v66_v10  ;;  %v94_v25 = vstv %s120_s29 }
  0x37   :  { %v128_v11 = vpop.eup %127 }
  0x38   :  { %v130_v12 = vpop.eup %129 }
  0x39   :  { %v132_v13 = vpop.eup %131  ;;  %v68_v14 = vadd.f32 %v130_v12, %v128_v11 }
  0x3b   :  { %v69_v15 = vadd.f32 %v132_v13, %v68_v14 }
  0x3d   :  { %133 = vrcp.f32 %v69_v15 }
  0x4a   :  { %v134_v19 = vpop.eup %133 }
  0x4b   :  { %v74_v20 = vmul.f32 %v134_v19, %v73_v16  ;;  %v82_v21 = vmul.f32 %v134_v19, %v81_v17  ;;  %v91_v22 = vmul.f32 %v134_v19, %v90_v18 }
  0x4d   :  { %v75_v26 = vmul.f32 %v128_v11, %v74_v20  ;;  %v83_v27 = vmul.f32 %v130_v12, %v82_v21  ;;  %v92_v28 = vmul.f32 %v132_v13, %v91_v22 }
  0x4f   :  { %v78_v29 = vadd.f32 %v77_v23, %v75_v26  ;;  %v86_v30 = vadd.f32 %v85_v24, %v83_v27  ;;  %v95_v31 = vadd.f32 %v94_v25, %v92_v28 }
  0x51   :  { %79 = vst [vmem:[#allocation9] sm:$0xff] %v78_v29  ;;  %88 = vst [vmem:[#allocation9 + $0x8] sm:$0xff] %v86_v30 }
  0x52   :  { %97 = vst [vmem:[#allocation9 + $0x10] sm:$0xff] %v95_v31 }
  0x53   :  { %186 = shalt.err (!%p183_p0)
}
  0x54   :  { %109 = dma.vmem_to_hbm [thread:$0]  %s104_s4, 384, %s250_s3, [#allocation4], %s206_s0, %s206_s0, %s207_s1  }
  0x55   :  { %201 = dma.done.wait [#allocation4], 384  }
  0x56   :  { %202 = vsyncadd [#allocation4], 4294966912 }
  0x57   :  { %113 = vsyncpa [#allocation3], 1 }
  0x58   :  { %114 = vsyncpa [#allocation4], 1 }
  0x59   :  { %115 = vsyncpa [#allocation5], 1 }
  0x5a   :  { %116 = vsyncpa [#allocation6], 1 }

</bundles_post_ra>
